<compile_context>
chip_gen: v7x
topology: tpu7x:2x2x1
jax: 0.10.0
libtpu: 0.0.40
codegen_flags: <defaults>
</compile_context>

<pallas_src>
import jax
import jax.numpy as jnp
from jax.experimental import pallas as pl
from jax.experimental.pallas import tpu as pltpu

OUT_PAD = 128  # lane-dense padded output width (action_dim=2 -> 128)


def dqn_forward_kernel(x_ref, w1_ref, b1_ref, w2_ref, b2_ref, w3_ref, b3_ref,
                       out_ref):
    x = x_ref[...]                                    # (TB, S), S = 4
    w1 = w1_ref[...]                                  # (S, 128)
    b1 = b1_ref[...]                                  # (1, 128)

    # fc1: K=4 contraction as VPU broadcast multiply-adds (skip the MXU).
    tb = x.shape[0]
    h1 = jnp.broadcast_to(b1, (tb, w1.shape[1]))      # hoisted bias broadcast
    for k in range(x.shape[1]):                       # static unroll, S = 4
        h1 = h1 + x[:, k:k + 1] * w1[k:k + 1, :]      # (TB,1)*(1,128)
    h1 = jnp.maximum(h1, 0.0)                         # (TB, 128)

    # fc2: real MXU matmul (128x256), f32 accumulation, f32 epilogue.
    h2 = jnp.dot(h1, w2_ref[...], preferred_element_type=jnp.float32)
    h2 = jnp.maximum(h2 + b2_ref[...], 0.0)           # (TB, 256)

    # fc3: lane-dense padded output (256 x 128), unmasked stores.
    h3 = jnp.dot(h2, w3_ref[...], preferred_element_type=jnp.float32)
    out_ref[...] = (h3 + b3_ref[...]).astype(out_ref.dtype)   # (TB, 128)


def dqn_forward(x, params, *, tb=512):
    """x: (B, state_dim) float32. params: dict of w1,b1,w2,b2,w3,b3."""
    w1, b1, w2, b2, w3, b3 = (params[k] for k in
                              ("w1", "b1", "w2", "b2", "w3", "b3"))
    B, S = x.shape
    H1 = w1.shape[1]
    H2 = w2.shape[1]
    action_dim = w3.shape[1]

    # Zero-pad fc3 weights/bias to a lane-dense 128-wide output slab (once).
    w3p = jnp.pad(w3, ((0, 0), (0, OUT_PAD - action_dim)))
    b3p = jnp.pad(b3, ((0, 0), (0, OUT_PAD - action_dim)))

    # Pick a batch tile: multiple of 8 sublanes, capped at `tb`; pad B to it.
    b_pad = -(-B // 8) * 8
    TB = min(tb, b_pad)
    b_pad = -(-b_pad // TB) * TB
    if b_pad != B:
        x = jnp.pad(x, ((0, b_pad - B), (0, 0)))
    grid = (pl.cdiv(b_pad, TB),)

    # Weights/biases: constant index_map -> VMEM-resident across grid steps.
    resident = lambda a: pl.BlockSpec(a.shape, lambda i: (0,) * a.ndim)

    out = pl.pallas_call(
        dqn_forward_kernel,
        out_shape=jax.ShapeDtypeStruct((b_pad, OUT_PAD), jnp.float32),
        grid=grid,
        in_specs=[
            pl.BlockSpec((TB, S), lambda i: (i, 0)),          # x (tiled)
            resident(w1), resident(b1),
            resident(w2), resident(b2),
            resident(w3p), resident(b3p),
        ],
        out_specs=pl.BlockSpec((TB, OUT_PAD), lambda i: (i, 0)),
        compiler_params=pltpu.CompilerParams(
            dimension_semantics=("parallel",)),
    )(x, w1, b1, w2, b2, w3p, b3p)

    return out[:B, :action_dim]


def init_params(key, state_dim=4, action_dim=2):
    """Deterministic synthetic init (uniform, like torch default fan-in)."""
    ks = jax.random.split(key, 6)

    def linear(kw, kb, fan_in, fan_out):
        bound = 1.0 / jnp.sqrt(jnp.float32(fan_in))
        w = jax.random.uniform(kw, (fan_in, fan_out), jnp.float32,
                               -bound, bound)
        b = jax.random.uniform(kb, (1, fan_out), jnp.float32, -bound, bound)
        return w, b

    w1, b1 = linear(ks[0], ks[1], state_dim, 128)
    w2, b2 = linear(ks[2], ks[3], 128, 256)
    w3, b3 = linear(ks[4], ks[5], 256, action_dim)
    return dict(w1=w1, b1=b1, w2=w2, b2=b2, w3=w3, b3=b3)


def dqn_forward_ref(x, p):
    h1 = jnp.maximum(x @ p["w1"] + p["b1"], 0.0)
    h2 = jnp.maximum(h1 @ p["w2"] + p["b2"], 0.0)
    return h2 @ p["w3"] + p["b3"]


if __name__ == "__main__":
    key = jax.random.PRNGKey(0)
    k_param, k_x1, k_x2 = jax.random.split(key, 3)

    state_dim, action_dim = 4, 2
    params = init_params(k_param, state_dim, action_dim)

    # Small "inference" batch (single grid step, batch padded to sublane 8).
    batch = 8
    x_small = jax.random.normal(k_x1, (batch, state_dim), jnp.float32)
    out_small = jax.block_until_ready(dqn_forward(x_small, params))
    ref_small = jax.block_until_ready(dqn_forward_ref(x_small, params))
    assert out_small.shape == (batch, action_dim)
    assert jnp.allclose(out_small, ref_small, atol=1e-4, rtol=1e-4)

    # Ragged replay-buffer batch: exercises the batch grid + padding path.
    big = 1000  # -> padded to 1024, grid=(2,)
    x_big = jax.random.normal(k_x2, (big, state_dim), jnp.float32)
    out_big = jax.block_until_ready(dqn_forward(x_big, params))
    ref_big = jax.block_until_ready(dqn_forward_ref(x_big, params))
    assert out_big.shape == (big, action_dim)
    assert jnp.allclose(out_big, ref_big, atol=1e-4, rtol=1e-4)

    print("KERNEL_OK")
</pallas_src>

<mosaic_0001>
module attributes {stable_mosaic.version = 11 : i64} {
  func.func @dqn_forward_kernel(%arg0: i32, %arg1: memref<8x4xf32, #tpu.memory_space<vmem>>, %arg2: memref<4x128xf32, #tpu.memory_space<vmem>>, %arg3: memref<1x128xf32, #tpu.memory_space<vmem>>, %arg4: memref<128x256xf32, #tpu.memory_space<vmem>>, %arg5: memref<1x256xf32, #tpu.memory_space<vmem>>, %arg6: memref<256x128xf32, #tpu.memory_space<vmem>>, %arg7: memref<1x128xf32, #tpu.memory_space<vmem>>, %arg8: memref<8x128xf32, #tpu.memory_space<vmem>>) attributes {dimension_semantics = [#tpu.dimension_semantics<parallel>], iteration_bounds = array<i64: 1>, scalar_prefetch = 0 : i64, scratch_operands = 0 : i64, tpu.core_type = #tpu.core_type<tc>, window_params = [{transform_indices = @transform_0, window_bounds = array<i64: 8, 4>}, {pipeline_mode = #tpu.pipeline_mode<synchronous>, transform_indices = @transform_1, window_bounds = array<i64: 4, 128>}, {pipeline_mode = #tpu.pipeline_mode<synchronous>, transform_indices = @transform_2, window_bounds = array<i64: 1, 128>}, {pipeline_mode = #tpu.pipeline_mode<synchronous>, transform_indices = @transform_3, window_bounds = array<i64: 128, 256>}, {pipeline_mode = #tpu.pipeline_mode<synchronous>, transform_indices = @transform_4, window_bounds = array<i64: 1, 256>}, {pipeline_mode = #tpu.pipeline_mode<synchronous>, transform_indices = @transform_5, window_bounds = array<i64: 256, 128>}, {pipeline_mode = #tpu.pipeline_mode<synchronous>, transform_indices = @transform_6, window_bounds = array<i64: 1, 128>}, {transform_indices = @transform_7, window_bounds = array<i64: 8, 128>}]} {
    %c0 = arith.constant 0 : index
    %c0_0 = arith.constant 0 : index
    %0 = vector.load %arg1[%c0, %c0_0] : memref<8x4xf32, #tpu.memory_space<vmem>>, vector<8x4xf32>
    %c0_1 = arith.constant 0 : index
    %c0_2 = arith.constant 0 : index
    %1 = vector.load %arg2[%c0_1, %c0_2] : memref<4x128xf32, #tpu.memory_space<vmem>>, vector<4x128xf32>
    %c0_3 = arith.constant 0 : index
    %c0_4 = arith.constant 0 : index
    %2 = vector.load %arg3[%c0_3, %c0_4] : memref<1x128xf32, #tpu.memory_space<vmem>>, vector<1x128xf32>
    %3 = vector.shape_cast %2 : vector<1x128xf32> to vector<1x128xf32>
    %4 = vector.broadcast %3 : vector<1x128xf32> to vector<8x128xf32>
    %5 = vector.extract_strided_slice %0 {offsets = [0, 0], sizes = [8, 1], strides = [1, 1]} : vector<8x4xf32> to vector<8x1xf32>
    %6 = vector.extract_strided_slice %1 {offsets = [0, 0], sizes = [1, 128], strides = [1, 1]} : vector<4x128xf32> to vector<1x128xf32>
    %7 = vector.broadcast %5 : vector<8x1xf32> to vector<8x128xf32>
    %8 = vector.broadcast %6 : vector<1x128xf32> to vector<8x128xf32>
    %9 = arith.mulf %7, %8 : vector<8x128xf32>
    %10 = arith.addf %4, %9 : vector<8x128xf32>
    %11 = vector.extract_strided_slice %0 {offsets = [0, 1], sizes = [8, 1], strides = [1, 1]} : vector<8x4xf32> to vector<8x1xf32>
    %12 = vector.extract_strided_slice %1 {offsets = [1, 0], sizes = [1, 128], strides = [1, 1]} : vector<4x128xf32> to vector<1x128xf32>
    %13 = vector.broadcast %11 : vector<8x1xf32> to vector<8x128xf32>
    %14 = vector.broadcast %12 : vector<1x128xf32> to vector<8x128xf32>
    %15 = arith.mulf %13, %14 : vector<8x128xf32>
    %16 = arith.addf %10, %15 : vector<8x128xf32>
    %17 = vector.extract_strided_slice %0 {offsets = [0, 2], sizes = [8, 1], strides = [1, 1]} : vector<8x4xf32> to vector<8x1xf32>
    %18 = vector.extract_strided_slice %1 {offsets = [2, 0], sizes = [1, 128], strides = [1, 1]} : vector<4x128xf32> to vector<1x128xf32>
    %19 = vector.broadcast %17 : vector<8x1xf32> to vector<8x128xf32>
    %20 = vector.broadcast %18 : vector<1x128xf32> to vector<8x128xf32>
    %21 = arith.mulf %19, %20 : vector<8x128xf32>
    %22 = arith.addf %16, %21 : vector<8x128xf32>
    %23 = vector.extract_strided_slice %0 {offsets = [0, 3], sizes = [8, 1], strides = [1, 1]} : vector<8x4xf32> to vector<8x1xf32>
    %24 = vector.extract_strided_slice %1 {offsets = [3, 0], sizes = [1, 128], strides = [1, 1]} : vector<4x128xf32> to vector<1x128xf32>
    %25 = vector.broadcast %23 : vector<8x1xf32> to vector<8x128xf32>
    %26 = vector.broadcast %24 : vector<1x128xf32> to vector<8x128xf32>
    %27 = arith.mulf %25, %26 : vector<8x128xf32>
    %28 = arith.addf %22, %27 : vector<8x128xf32>
    %cst = arith.constant 0.000000e+00 : f32
    %29 = vector.broadcast %cst : f32 to vector<8x128xf32>
    %30 = arith.maximumf %28, %29 : vector<8x128xf32>
    %c0_5 = arith.constant 0 : index
    %c0_6 = arith.constant 0 : index
    %31 = vector.load %arg4[%c0_5, %c0_6] : memref<128x256xf32, #tpu.memory_space<vmem>>, vector<128x256xf32>
    %cst_7 = arith.constant dense<0.000000e+00> : vector<8x256xf32>
    %32 = tpu.matmul %30, %31, %cst_7 {dimension_numbers = #tpu.dot_dimension_numbers<[1], [0], [0], [1], [0, 0, 1, 1], [], []>} : vector<8x128xf32>, vector<128x256xf32>, vector<8x256xf32> -> vector<8x256xf32>
    %c0_8 = arith.constant 0 : index
    %c0_9 = arith.constant 0 : index
    %33 = vector.load %arg5[%c0_8, %c0_9] : memref<1x256xf32, #tpu.memory_space<vmem>>, vector<1x256xf32>
    %34 = vector.broadcast %33 : vector<1x256xf32> to vector<8x256xf32>
    %35 = arith.addf %32, %34 : vector<8x256xf32>
    %cst_10 = arith.constant 0.000000e+00 : f32
    %36 = vector.broadcast %cst_10 : f32 to vector<8x256xf32>
    %37 = arith.maximumf %35, %36 : vector<8x256xf32>
    %c0_11 = arith.constant 0 : index
    %c0_12 = arith.constant 0 : index
    %38 = vector.load %arg6[%c0_11, %c0_12] : memref<256x128xf32, #tpu.memory_space<vmem>>, vector<256x128xf32>
    %cst_13 = arith.constant dense<0.000000e+00> : vector<8x128xf32>
    %39 = tpu.matmul %37, %38, %cst_13 {dimension_numbers = #tpu.dot_dimension_numbers<[1], [0], [0], [1], [0, 0, 1, 1], [], []>} : vector<8x256xf32>, vector<256x128xf32>, vector<8x128xf32> -> vector<8x128xf32>
    %c0_14 = arith.constant 0 : index
    %c0_15 = arith.constant 0 : index
    %40 = vector.load %arg7[%c0_14, %c0_15] : memref<1x128xf32, #tpu.memory_space<vmem>>, vector<1x128xf32>
    %41 = vector.broadcast %40 : vector<1x128xf32> to vector<8x128xf32>
    %42 = arith.addf %39, %41 : vector<8x128xf32>
    %c0_16 = arith.constant 0 : index
    %c0_17 = arith.constant 0 : index
    %43 = vector.load %arg8[%c0_16, %c0_17] : memref<8x128xf32, #tpu.memory_space<vmem>>, vector<8x128xf32>
    tpu.vector_store %arg8[%c0_16, %c0_17], %42 {strides = array<i32>} : memref<8x128xf32, #tpu.memory_space<vmem>>, vector<8x128xf32>,
    return
  }
  func.func @transform_0(%arg0: i32) -> (i32, i32) {
    %c0_i32 = arith.constant 0 : i32
    %c0_i32_0 = arith.constant 0 : i32
    return %arg0, %c0_i32 : i32, i32
  }
  func.func @transform_1(%arg0: i32) -> (i32, i32) {
    %c0_i32 = arith.constant 0 : i32
    %c0_i32_0 = arith.constant 0 : i32
    %c0_i32_1 = arith.constant 0 : i32
    return %c0_i32, %c0_i32_0 : i32, i32
  }
  func.func @transform_2(%arg0: i32) -> (i32, i32) {
    %c0_i32 = arith.constant 0 : i32
    %c0_i32_0 = arith.constant 0 : i32
    %c0_i32_1 = arith.constant 0 : i32
    return %c0_i32, %c0_i32_0 : i32, i32
  }
  func.func @transform_3(%arg0: i32) -> (i32, i32) {
    %c0_i32 = arith.constant 0 : i32
    %c0_i32_0 = arith.constant 0 : i32
    %c0_i32_1 = arith.constant 0 : i32
    return %c0_i32, %c0_i32_0 : i32, i32
  }
  func.func @transform_4(%arg0: i32) -> (i32, i32) {
    %c0_i32 = arith.constant 0 : i32
    %c0_i32_0 = arith.constant 0 : i32
    %c0_i32_1 = arith.constant 0 : i32
    return %c0_i32, %c0_i32_0 : i32, i32
  }
  func.func @transform_5(%arg0: i32) -> (i32, i32) {
    %c0_i32 = arith.constant 0 : i32
    %c0_i32_0 = arith.constant 0 : i32
    %c0_i32_1 = arith.constant 0 : i32
    return %c0_i32, %c0_i32_0 : i32, i32
  }
  func.func @transform_6(%arg0: i32) -> (i32, i32) {
    %c0_i32 = arith.constant 0 : i32
    %c0_i32_0 = arith.constant 0 : i32
    %c0_i32_1 = arith.constant 0 : i32
    return %c0_i32, %c0_i32_0 : i32, i32
  }
  func.func @transform_7(%arg0: i32) -> (i32, i32) {
    %c0_i32 = arith.constant 0 : i32
    %c0_i32_0 = arith.constant 0 : i32
    return %arg0, %c0_i32 : i32, i32
  }
}

</mosaic_0001>

<bundles_post_ra>
// kernel: tpu_custom_call.1
= control target key start
LH: loop header
LB: loop body
LE: loop exit
PB: predicated region body
PF: predicated region fallthrough
CT: control target
= control target key end

     0   :  { %12 = vsyncpa [#allocation3], 0  ;;  %s642_s0 = inlined_call_operand.vmem [shape: f32[8,4], index: 0, kind: input, shape index: {}]   ;;  %s643_s1 = inlined_call_operand.vmem [shape: f32[4,128], index: 1, kind: input, shape index: {}]   ;;  %s644_s2 = inlined_call_operand.vmem [shape: f32[1,128], index: 2, kind: input, shape index: {}]   ;;  %s645_s3 = inlined_call_operand.hbm [shape: f32[128,256], index: 3, kind: input, shape index: {}]   ;;  %s646_s4 = inlined_call_operand.vmem [shape: f32[1,256], index: 4, kind: input, shape index: {}]   ;;  %s647_s5 = inlined_call_operand.hbm [shape: f32[256,128], index: 5, kind: input, shape index: {}]   ;;  %s648_s6 = inlined_call_operand.vmem [shape: f32[1,128], index: 6, kind: input, shape index: {}]   ;;  %s649_s7 = inlined_call_operand.hbm [shape: f32[8,128], index: 7, kind: output, shape index: {}]  }
   0x1   :  { %13 = vsyncpa [#allocation6], 0 }
   0x2   :  { %14 = vsyncpa [#allocation4], 0  ;;  %s539_s24 = smov [#allocation2]   ;;  %s467_s28 = scalar_lea.hbm %s645_s3, 4096 }
   0x3   :  { %s26_s25 = sshll.u32 %s539_s24, 4  ;;  %p468_p0 = scmp.ne.s32.totalorder %s645_s3, %s467_s28  ;;  %s27_s25 = int_to_ptr.vmem [resolvable:$true] %s26_s25 }
   0x4   :  { %p471_p1 = scmp.lt.u32.totalorder %s467_s28, %s645_s3 }
   0x6   :  { %p473_p2 = pnand %p471_p1, %p468_p0 }
   0x8   :  { %476 = shalt.err (!%p473_p2)
}
   0x9   :  { %s477_s10 = scalar_lea.vmem %s27_s25, 4096  ;;  %p482_p4 = scmp.lt.s32.totalorder %s27_s25, %s27_s25 }
   0xa   :  { %p478_p3 = scmp.ne.s32.totalorder %s27_s25, %s477_s10  ;;  %p483_p5 = scmp.lt.s32.totalorder %s477_s10, %s477_s10 }
   0xc   :  { %p484_p6 = por %p483_p5, %p482_p4 }
   0xe   :  { %p485_p7 = pnand %p484_p6, %p478_p3 }
  0x10   :  { %488 = shalt.err (!%p485_p7)
}
  0x11   :  { %s540_s11 = smov 256   ;;  %s541_s12 = smov 16  }
  0x12   :  { %32 = dma.hbm_to_vmem [thread:$0]  %s645_s3, 4096, %s27_s25, [#allocation3], %s540_s11, %s540_s11, %s541_s12  }
  0x13   :  { %s542_s15 = smov [#allocation5]   ;;  %s489_s19 = scalar_lea.hbm %s647_s5, 4096 }
  0x14   :  { %s40_s16 = sshll.u32 %s542_s15, 4  ;;  %p490_p8 = scmp.ne.s32.totalorder %s647_s5, %s489_s19  ;;  %s41_s16 = int_to_ptr.vmem [resolvable:$true] %s40_s16 }
  0x15   :  { %p493_p9 = scmp.lt.u32.totalorder %s489_s19, %s647_s5 }
  0x17   :  { %p495_p10 = pnand %p493_p9, %p490_p8 }
  0x19   :  { %498 = shalt.err (!%p495_p10)
}
  0x1a   :  { %s499_s24 = scalar_lea.vmem %s41_s16, 4096  ;;  %p504_p12 = scmp.lt.s32.totalorder %s41_s16, %s41_s16 }
  0x1b   :  { %p500_p11 = scmp.ne.s32.totalorder %s41_s16, %s499_s24  ;;  %p505_p13 = scmp.lt.s32.totalorder %s499_s24, %s499_s24 }
  0x1d   :  { %p506_p0 = por %p505_p13, %p504_p12 }
  0x1f   :  { %p507_p1 = pnand %p506_p0, %p500_p11 }
  0x21   :  { %510 = shalt.err (!%p507_p1)
}
  0x22   :  { %s543_s3 = smov 128   ;;  %s544_s25 = smov 8  }
  0x23   :  { %46 = dma.hbm_to_vmem [thread:$0]  %s647_s5, 4096, %s41_s16, [#allocation6], %s543_s3, %s543_s3, %s544_s25  }
  0x24   :  { %533 = dma.done.wait [#allocation3], 4096  }
  0x25   :  { %534 = vsyncadd [#allocation3], 4294963200 }
  0x26   :  { %535 = dma.done.wait [#allocation6], 4096  }
  0x27   :  { %536 = vsyncadd [#allocation6], 4294963200  ;;  %v545_v0 = vmov 0   ;;  %v546_v1 = vmov 2   ;;  %v55_v2 = vld [vmem:[%s642_s0] sm:$0xff]  ;;  %v107_v3 = vld [vmem:[#allocation2 + $0x8] sm:$0xff] }
  0x28   :  { %462 = vset.pattern.permute.xlu0 %v545_v0  ;;  %464 = vset.pattern.permute.xlu1 %v546_v1  ;;  %v109_v4 = vld [vmem:[#allocation2 + $0x18] sm:$0xff]  ;;  %v106_v6 = vld [vmem:[#allocation2] sm:$0xff]  ;;  %v108_v7 = vld [vmem:[#allocation2 + $0x10] sm:$0xff]  ;;  %v547_v17 = vmov 1   ;;  %v548_v18 = vmov 3   ;;  %v549_v38 = vmov 0.0  }
  0x29   :  { %66 = vperm.xlu0 %462, %v55_v2   ;;  %86 = vperm.xlu1 %464, %v55_v2   ;;  %v386_v5 = vpack.c.bf16 %v109_v4, %v107_v3  ;;  %v111_v8 = vld [vmem:[#allocation2 + $0x28] sm:$0xff]  ;;  %v388_v9 = vpack.c.bf16 %v108_v7, %v106_v6  ;;  %v113_v10 = vld [vmem:[#allocation2 + $0x38] sm:$0xff]  ;;  %v110_v11 = vld [vmem:[#allocation2 + $0x20] sm:$0xff]  ;;  %s550_s11 = smov [#allocation7]  }
  0x2a   :  { %v112_v12 = vld [vmem:[#allocation2 + $0x30] sm:$0xff]  ;;  %v390_v13 = vpack.c.bf16 %v113_v10, %v111_v8  ;;  %v115_v14 = vld [vmem:[#allocation2 + $0x48] sm:$0xff]  ;;  %v117_v15 = vld [vmem:[#allocation2 + $0x58] sm:$0xff]  ;;  %214 = vmatprep.mubr.f32.mxu0 %v549_v38  ;;  %s339_s12 = sshll.u32 %s550_s11, 4  ;;  %s340_s12 = int_to_ptr.vmem [resolvable:$true] %s339_s12 }
  0x2b   :  { %387 = vmatprep.subr.bf16.mxu0 %v386_v5  ;;  %v392_v16 = vpack.c.bf16 %v112_v12, %v110_v11  ;;  %v394_v19 = vpack.c.bf16 %v117_v15, %v115_v14  ;;  %v114_v20 = vld [vmem:[#allocation2 + $0x40] sm:$0xff]  ;;  %v116_v21 = vld [vmem:[#allocation2 + $0x50] sm:$0xff]  ;;  %v119_v22 = vld [vmem:[#allocation2 + $0x68] sm:$0xff]  ;;  %p516_p3 = scmp.lt.s32.totalorder %s340_s12, %s340_s12 }
  0x2c   :  { %389 = vmatpush1.bf16.msra.mxu0 %v388_v9  ;;  %v121_v23 = vld [vmem:[#allocation2 + $0x78] sm:$0xff]  ;;  %v396_v24 = vpack.c.bf16 %v116_v21, %v114_v20  ;;  %v118_v26 = vld [vmem:[#allocation2 + $0x60] sm:$0xff]  ;;  %v120_v27 = vld [vmem:[#allocation2 + $0x70] sm:$0xff] }
  0x2d   :  { %463 = vset.pattern.permute.xlu0 %v547_v17  ;;  %465 = vset.pattern.permute.xlu1 %v548_v18  ;;  %v398_v25 = vpack.c.bf16 %v121_v23, %v119_v22  ;;  %v123_v28 = vld [vmem:[#allocation2 + $0x88] sm:$0xff]  ;;  %v125_v29 = vld [vmem:[#allocation2 + $0x98] sm:$0xff]  ;;  %v400_v30 = vpack.c.bf16 %v120_v27, %v118_v26  ;;  %v122_v32 = vld [vmem:[#allocation2 + $0x80] sm:$0xff] }
  0x2e   :  { %76 = vperm.xlu0 %463, %v55_v2   ;;  %96 = vperm.xlu1 %465, %v55_v2   ;;  %v402_v31 = vpack.c.bf16 %v125_v29, %v123_v28  ;;  %v124_v33 = vld [vmem:[#allocation2 + $0x90] sm:$0xff]  ;;  %v127_v34 = vld [vmem:[#allocation2 + $0xa8] sm:$0xff]  ;;  %v129_v35 = vld [vmem:[#allocation2 + $0xb8] sm:$0xff]  ;;  %v69_v29 = vlaneseq }
  0x2f   :  { %391 = vmatprep.subr.bf16.mxu0 %v390_v13  ;;  %v126_v36 = vld [vmem:[#allocation2 + $0xa0] sm:$0xff]  ;;  %v128_v37 = vld [vmem:[#allocation2 + $0xb0] sm:$0xff]  ;;  %v404_v39 = vpack.c.bf16 %v124_v33, %v122_v32  ;;  %v131_v40 = vld [vmem:[#allocation2 + $0xc8] sm:$0xff]  ;;  %v406_v45 = vpack.c.bf16 %v129_v35, %v127_v34 }
  0x30   :  { %393 = vmatpush1.bf16.msra.mxu0 %v392_v16  ;;  %v133_v41 = vld [vmem:[#allocation2 + $0xd8] sm:$0xff]  ;;  %v239_v42 = vld [vmem:[#allocation5 + $0x80] sm:$0xff]  ;;  %v240_v43 = vld [vmem:[#allocation5 + $0x88] sm:$0xff]  ;;  %v408_v56 = vpack.c.bf16 %v128_v37, %v126_v36 }
  0x31   :  { %395 = vmatprep.subr.bf16.mxu0 %v394_v19  ;;  %v223_v44 = vld [vmem:[#allocation5] sm:$0xff]  ;;  %v418_v46 = vpack.c.bf16 %v240_v43, %v239_v42  ;;  %v224_v47 = vld [vmem:[#allocation5 + $0x8] sm:$0xff]  ;;  %v241_v48 = vld [vmem:[#allocation5 + $0x90] sm:$0xff]  ;;  %v410_v60 = vpack.c.bf16 %v133_v41, %v131_v40 }
  0x32   :  { %466 = vset.pattern.permute.xlu0 %v548_v18  ;;  %v242_v49 = vld [vmem:[#allocation5 + $0x98] sm:$0xff]  ;;  %v420_v50 = vpack.c.bf16 %v224_v47, %v223_v44  ;;  %v225_v52 = vld [vmem:[#allocation5 + $0x10] sm:$0xff]  ;;  %v243_v54 = vld [vmem:[#allocation5 + $0xa0] sm:$0xff] }
  0x33   :  { %v422_v51 = vpack.c.bf16 %v242_v49, %v241_v48  ;;  %v226_v53 = vld [vmem:[#allocation5 + $0x18] sm:$0xff]  ;;  %419 = vmatprep.subr.bf16.mxu1 %v418_v46  ;;  %v244_v55 = vld [vmem:[#allocation5 + $0xa8] sm:$0xff]  ;;  %v130_v57 = vld [vmem:[#allocation2 + $0xc0] sm:$0xff] }
  0x34   :  { %397 = vmatpush1.bf16.msra.mxu0 %v396_v24  ;;  %v132_v58 = vld [vmem:[#allocation2 + $0xd0] sm:$0xff]  ;;  %421 = vmatpush3.bf16.msra.mxu1 %v420_v50  ;;  %v424_v59 = vpack.c.bf16 %v226_v53, %v225_v52  ;;  %v135_v61 = vld [vmem:[#allocation2 + $0xe8] sm:$0xff]  ;;  %v426_v62 = vpack.c.bf16 %v244_v55, %v243_v54  ;;  %v227_v63 = vld [vmem:[#allocation5 + $0x20] sm:$0xff] }
  0x35   :  { %399 = vmatprep.subr.bf16.mxu0 %v398_v25  ;;  %423 = vmatprep.subr.bf16.mxu1 %v422_v51  ;;  %v228_v0 = vld [vmem:[#allocation5 + $0x28] sm:$0xff]  ;;  %v137_v1 = vld [vmem:[#allocation2 + $0xf8] sm:$0xff]  ;;  %v245_v2 = vld [vmem:[#allocation5 + $0xb0] sm:$0xff]  ;;  %v412_v4 = vpack.c.bf16 %v132_v58, %v130_v57 }
  0x36   :  { %v246_v3 = vld [vmem:[#allocation5 + $0xb8] sm:$0xff]  ;;  %v134_v5 = vld [vmem:[#allocation2 + $0xe0] sm:$0xff]  ;;  %v428_v6 = vpack.c.bf16 %v228_v0, %v227_v63  ;;  %v414_v7 = vpack.c.bf16 %v137_v1, %v135_v61  ;;  %v136_v8 = vld [vmem:[#allocation2 + $0xf0] sm:$0xff] }
  0x37   :  { %v430_v9 = vpack.c.bf16 %v246_v3, %v245_v2  ;;  %v229_v10 = vld [vmem:[#allocation5 + $0x30] sm:$0xff]  ;;  %v230_v11 = vld [vmem:[#allocation5 + $0x38] sm:$0xff]  ;;  %v247_v12 = vld [vmem:[#allocation5 + $0xc0] sm:$0xff]  ;;  %v416_v14 = vpack.c.bf16 %v136_v8, %v134_v5 }
  0x38   :  { %401 = vmatpush1.bf16.msra.mxu0 %v400_v30  ;;  %425 = vmatpush3.bf16.msra.mxu1 %v424_v59  ;;  %v248_v13 = vld [vmem:[#allocation5 + $0xc8] sm:$0xff]  ;;  %v432_v15 = vpack.c.bf16 %v230_v11, %v229_v10  ;;  %v231_v17 = vld [vmem:[#allocation5 + $0x40] sm:$0xff]  ;;  %v249_v19 = vld [vmem:[#allocation5 + $0xd0] sm:$0xff]  ;;  %v70_v30 = vshrl.u32 %v69_v29, 7 }
  0x39   :  { %403 = vmatprep.subr.bf16.mxu0 %v402_v31  ;;  %427 = vmatprep.subr.bf16.mxu1 %v426_v62  ;;  %v434_v16 = vpack.c.bf16 %v248_v13, %v247_v12  ;;  %v232_v18 = vld [vmem:[#allocation5 + $0x48] sm:$0xff]  ;;  %v250_v20 = vld [vmem:[#allocation5 + $0xd8] sm:$0xff]  ;;  %v233_v23 = vld [vmem:[#allocation5 + $0x50] sm:$0xff] }
  0x3a   :  { %v436_v21 = vpack.c.bf16 %v232_v18, %v231_v17  ;;  %v438_v22 = vpack.c.bf16 %v250_v20, %v249_v19  ;;  %v234_v24 = vld [vmem:[#allocation5 + $0x58] sm:$0xff]  ;;  %v251_v25 = vld [vmem:[#allocation5 + $0xe0] sm:$0xff]  ;;  %v252_v26 = vld [vmem:[#allocation5 + $0xe8] sm:$0xff]  ;;  %v71_v31 = vsub.s32 0, %v70_v30  ;;  %v81_v34 = vsub.s32 1, %v70_v30 }
  0x3b   :  { %v440_v27 = vpack.c.bf16 %v234_v24, %v233_v23  ;;  %v442_v28 = vpack.c.bf16 %v252_v26, %v251_v25  ;;  %v56_v32 = vld [vmem:[%s643_s1] sm:$0xf]  ;;  %v91_v36 = vsub.s32 2, %v70_v30  ;;  %v101_v38 = vsub.s32 3, %v70_v30  ;;  %v236_v55 = vld [vmem:[#allocation5 + $0x68] sm:$0xff]  ;;  %v253_v57 = vld [vmem:[#allocation5 + $0xf0] sm:$0xff] }
  0x3c   :  { %405 = vmatpush1.bf16.msra.mxu0 %v404_v39  ;;  %429 = vmatpush3.bf16.msra.mxu1 %v428_v6  ;;  %v72_v33 = vrot.slane %v56_v32, %v71_v31  ;;  %v82_v40 = vrot.slane %v56_v32, %v81_v34  ;;  %v349_v41 = vld [vmem:[%s644_s2] ss:$0 sm:$0xff]  ;;  %v254_v58 = vld [vmem:[#allocation5 + $0xf8] sm:$0xff] }
  0x3d   :  { %407 = vmatprep.subr.bf16.mxu0 %v406_v45  ;;  %431 = vmatprep.subr.bf16.mxu1 %v430_v9  ;;  %v92_v42 = vrot.slane %v56_v32, %v91_v36  ;;  %v102_v43 = vrot.slane %v56_v32, %v101_v38  ;;  %v235_v54 = vld [vmem:[#allocation5 + $0x60] sm:$0xff]  ;;  %v446_v59 = vpack.c.bf16 %v254_v58, %v253_v57  ;;  %v238_v61 = vld [vmem:[#allocation5 + $0x78] sm:$0xff] }
  0x3e   :  { %v138_v63 = vld [vmem:[%s646_s4] sm:$0x3]  ;;  %s511_s4 = scalar_lea.vmem %s340_s12, 128 }
  0x3f   :  { %v143_v0 = vrot.slane %v138_v63, %v71_v31  ;;  %v147_v1 = vrot.slane %v138_v63, %v81_v34  ;;  %v350_v9 = vld [vmem:[%s648_s6] ss:$0 sm:$0xff]  ;;  %p512_p2 = scmp.ne.s32.totalorder %s340_s12, %s511_s4  ;;  %p517_p4 = scmp.lt.s32.totalorder %s511_s4, %s511_s4 }
  0x40   :  { %409 = vmatpush1.bf16.msra.mxu0 %v408_v56  ;;  %433 = vmatpush3.bf16.msra.mxu1 %v432_v15  ;;  %v444_v56 = vpack.c.bf16 %v236_v55, %v235_v54 }
  0x41   :  { %411 = vmatprep.subr.bf16.mxu0 %v410_v60  ;;  %435 = vmatprep.subr.bf16.mxu1 %v434_v16  ;;  %v237_v60 = vld [vmem:[#allocation5 + $0x70] sm:$0xff]  ;;  %p518_p5 = por %p517_p4, %p516_p3 }
  0x42   :  { %v448_v62 = vpack.c.bf16 %v238_v61, %v237_v60 }
  0x43   :  { %p519_p6 = pnand %p518_p5, %p512_p2 }
  0x44   :  { %413 = vmatpush1.bf16.msra.mxu0 %v412_v4  ;;  %437 = vmatpush3.bf16.msra.mxu1 %v436_v21 }
  0x45   :  { %415 = vmatprep.subr.bf16.mxu0 %v414_v7  ;;  %439 = vmatprep.subr.bf16.mxu1 %v438_v22 }
  0x48   :  { %417 = vmatpush1.bf16.msra.mxu0 %v416_v14  ;;  %441 = vmatpush3.bf16.msra.mxu1 %v440_v27 }
  0x49   :  { %443 = vmatprep.subr.bf16.mxu1 %v442_v28 }
  0x4c   :  { %445 = vmatpush3.bf16.msra.mxu1 %v444_v56 }
  0x4d   :  { %447 = vmatprep.subr.bf16.mxu1 %v446_v59 }
  0x50   :  { %449 = vmatpush3.bf16.msra.mxu1 %v448_v62 }
  0xa8   :  { %v67_v35 = vpop.permute.xlu0 %66  ;;  %v87_v37 = vpop.permute.xlu1 %86 }
  0xa9   :  { %v73_v39 = vmul.f32 %v72_v33, %v67_v35  ;;  %v93_v48 = vmul.f32 %v92_v42, %v87_v37 }
  0xab   :  { %v74_v46 = vadd.f32 %v349_v41, %v73_v39 }
  0xad   :  { %v77_v44 = vpop.permute.xlu0 %76  ;;  %v97_v45 = vpop.permute.xlu1 %96 }
  0xae   :  { %v83_v47 = vmul.f32 %v82_v40, %v77_v44  ;;  %v103_v50 = vmul.f32 %v102_v43, %v97_v45 }
  0xb0   :  { %v84_v49 = vadd.f32 %v83_v47, %v74_v46 }
  0xb2   :  { %v94_v51 = vadd.f32 %v93_v48, %v84_v49 }
  0xb4   :  { %v104_v52 = vadd.f32 %v103_v50, %v94_v51 }
  0xb6   :  { %v105_v53 = vmax.f32 %v104_v52, 0.0 }
  0xb8   :  { %215 = vmatmul.mubr.f32.vlgmr.msra.gmra.mrb[0].mxu0 %v105_v53 }
 0x18b   :  { %v216_v2 = vpop.f32.mrb[0].mxu0 }
 0x18c   :  { %v217_v3 = vadd.f32 %v216_v2, %v143_v0  ;;  %v218_v4 = vpop.f32.mrb[1].mxu0 }
 0x18d   :  { %v219_v5 = vadd.f32 %v218_v4, %v147_v1 }
 0x18e   :  { %v221_v7 = vmax.f32 %v217_v3, 0.0 }
 0x18f   :  { %v222_v6 = vmax.f32 %v219_v5, 0.0 }
 0x191   :  { %326 = vmatprep.mubr.f32.mxu1 %v222_v6 }
 0x192   :  { %327 = vmatmul.mubr.f32.vlgmr.msra.gmra.mrb[0].mxu1 %v221_v7 }
 0x265   :  { %v383_v8 = vpop.f32.mrb[0].mxu1 }
 0x266   :  { %v384_v10 = vpop.f32.mrb[1].mxu1 }
 0x267   :  { %v385_v11 = vadd.f32 %v384_v10, %v383_v8 }
 0x269   :  { %v329_v12 = vadd.f32 %v385_v11, %v350_v9 }
 0x26b   :  { %332 = vst [vmem:[#allocation7] sm:$0xff] %v329_v12 }
 0x26c   :  { %522 = shalt.err (!%p519_p6)
}
 0x26d   :  { %s523_s15 = scalar_lea.hbm %s649_s7, 128 }
 0x26e   :  { %p524_p7 = scmp.ne.s32.totalorder %s649_s7, %s523_s15  ;;  %p527_p8 = scmp.lt.u32.totalorder %s523_s15, %s649_s7 }
 0x270   :  { %p529_p9 = pnand %p527_p8, %p524_p7 }
 0x272   :  { %532 = shalt.err (!%p529_p9)
}
 0x273   :  { %342 = dma.vmem_to_hbm [thread:$0]  %s340_s12, 128, %s649_s7, [#allocation4]  }
 0x274   :  { %537 = dma.done.wait [#allocation4], 128  }
 0x275   :  { %538 = vsyncadd [#allocation4], 4294967168 }
 0x276   :  { %346 = vsyncpa [#allocation3], 1 }
 0x277   :  { %347 = vsyncpa [#allocation6], 1 }
 0x278   :  { %348 = vsyncpa [#allocation4], 1 }

</bundles_post_ra>
